<compile_context>
chip_gen: v6e
topology: v6e:2x2x1
jax: 0.10.0
libtpu: 0.0.40
codegen_flags: <defaults>
</compile_context>

<pallas_src>
import jax
import jax.numpy as jnp
from jax.experimental import pallas as pl
from jax.experimental.pallas import tpu as pltpu


def dense_head_kernel(x_ref, w1_ref, b1_ref, w2_ref, b2_ref,
                      logits_ref, yhat_ref):
    # x_ref: (TB, H) CLS features in their native dtype (bf16 feeds the MXU directly).
    x = x_ref[...]

    # dropout (inference) -> identity
    # dense + bias + tanh; MXU accumulates in f32, bias/tanh stay f32.
    h = jnp.dot(x, w1_ref[...], preferred_element_type=jnp.float32) + b1_ref[...]
    h = jnp.tanh(h)

    # dropout (inference) -> identity
    # classifier head over the lane-padded label dim (padded columns carry bias -1e30).
    z = jnp.dot(h.astype(w2_ref.dtype), w2_ref[...],
                preferred_element_type=jnp.float32) + b2_ref[...]

    # softmax over labels; padded columns underflow to exactly 0 probability.
    zmax = jnp.max(z, axis=-1, keepdims=True)
    e = jnp.exp(z - zmax)
    denom = jnp.sum(e, axis=-1, keepdims=True)
    p = e * pl.reciprocal(denom, approx=False)        # EUP slot, exact mode
    logits_ref[...] = p.astype(logits_ref.dtype)

    # argmax from z (softmax is monotone): reuses zmax, runs in parallel with the divide.
    lp = z.shape[-1]
    idx = jax.lax.broadcasted_iota(jnp.int32, z.shape, 1)
    masked = jnp.where(z == zmax, idx, lp)            # first-max index, like torch.argmax
    yhat_ref[...] = jnp.min(masked, axis=-1, keepdims=True)


def dense_head_forward(last_hidden_state, w1, b1, w2, b2, *, tb=None):
    """last_hidden_state: (B, S, H). w1: (H, H), b1: (H,), w2: (H, L), b2: (L,).
    Returns (logits (B, L) softmax probabilities, y_hat (B,) int32)."""
    B, S, H = last_hidden_state.shape
    L = w2.shape[1]
    LP = max(128, pl.cdiv(L, 128) * 128)              # lane-dense padded label dim

    # Batch tile: multiple of 8 (or the full batch when small); bounds VMEM on v7x.
    if tb is None:
        tb = B if B <= 128 else 128
    grid = (pl.cdiv(B, tb),)

    # Fused CLS gather: view activations as (B, S*H); the CLS features of batch b are
    # columns [0, H) of row b, so the BlockSpec DMA reads only those rows from HBM.
    # (Requires H % 128 == 0 for a non-full last-dim block; otherwise fall back to an
    #  explicit slice, where the block's last dim equals the full array dim.)
    if H % 128 == 0:
        x_in = last_hidden_state.reshape(B, S * H)    # free contiguous reshape
    else:
        x_in = last_hidden_state[:, 0, :]             # fallback: explicit CLS slice
    x_spec = pl.BlockSpec((tb, H), lambda i: (i, 0))

    # Biases in f32 (accumulation precision); classifier weights/bias padded lane-dense.
    b1_2d = b1.astype(jnp.float32).reshape(1, H)
    w2_p = jnp.zeros((H, LP), dtype=w2.dtype).at[:, :L].set(w2)
    b2_p = jnp.full((1, LP), -1e30, dtype=jnp.float32).at[0, :L].set(
        b2.astype(jnp.float32))

    logits_p, yhat = pl.pallas_call(
        dense_head_kernel,
        out_shape=(
            jax.ShapeDtypeStruct((B, LP), jnp.float32),
            jax.ShapeDtypeStruct((B, 1), jnp.int32),
        ),
        grid=grid,
        in_specs=[
            x_spec,                                          # CLS rows, batch-tiled
            pl.BlockSpec((H, H), lambda i: (0, 0)),          # w1: VMEM-resident
            pl.BlockSpec((1, H), lambda i: (0, 0)),          # b1
            pl.BlockSpec((H, LP), lambda i: (0, 0)),         # w2 (lane-padded)
            pl.BlockSpec((1, LP), lambda i: (0, 0)),         # b2 (lane-padded)
        ],
        out_specs=(
            pl.BlockSpec((tb, LP), lambda i: (i, 0)),        # lane-dense logits slab
            pl.BlockSpec((tb, 1), lambda i: (i, 0)),         # y_hat (tiny writeback)
        ),
        compiler_params=pltpu.CompilerParams(
            dimension_semantics=("parallel",)),              # megacore on v7x
    )(x_in, w1, b1_2d, w2_p, b2_p)

    return logits_p[:, :L], yhat.reshape(B)


if __name__ == "__main__":
    # Small, module-consistent shapes: batch=8, seq=8, hidden=128, label_num=4.
    B, S, H, LBL = 8, 8, 128, 4

    key = jax.random.PRNGKey(0)
    k_x, k_w1, k_b1, k_w2, k_b2 = jax.random.split(key, 5)

    last_hidden_state = jax.random.normal(k_x, (B, S, H), dtype=jnp.float32)
    # Deterministic synthetic parameters (nn.Linear(H, H) / nn.Linear(H, LBL)).
    w1 = jax.random.normal(k_w1, (H, H), dtype=jnp.float32) * 0.05
    b1 = jax.random.normal(k_b1, (H,), dtype=jnp.float32) * 0.05
    w2 = jax.random.normal(k_w2, (H, LBL), dtype=jnp.float32) * 0.05
    b2 = jax.random.normal(k_b2, (LBL,), dtype=jnp.float32) * 0.05

    logits, y_hat = dense_head_forward(last_hidden_state, w1, b1, w2, b2)
    jax.block_until_ready((logits, y_hat))

    # Reference check in plain JAX.
    cls = last_hidden_state[:, 0, :]
    h_ref = jnp.tanh(cls @ w1 + b1)
    z_ref = h_ref @ w2 + b2
    logits_ref = jax.nn.softmax(z_ref, axis=-1)
    yhat_ref = jnp.argmax(logits_ref, axis=-1)

    assert jnp.allclose(logits, logits_ref, atol=1e-5), "logits mismatch"
    assert jnp.all(y_hat == yhat_ref), "y_hat mismatch"
    assert logits.shape == (B, LBL) and y_hat.shape == (B,)

    print("KERNEL_OK")
</pallas_src>

<mosaic_0001>
module attributes {stable_mosaic.version = 11 : i64} {
  func.func @dense_head_kernel(%arg0: i32, %arg1: memref<8x128xf32, #tpu.memory_space<vmem>>, %arg2: memref<128x128xf32, #tpu.memory_space<vmem>>, %arg3: memref<1x128xf32, #tpu.memory_space<vmem>>, %arg4: memref<128x128xf32, #tpu.memory_space<vmem>>, %arg5: memref<1x128xf32, #tpu.memory_space<vmem>>, %arg6: memref<8x128xf32, #tpu.memory_space<vmem>>, %arg7: memref<8x1xi32, #tpu.memory_space<vmem>>) attributes {dimension_semantics = [#tpu.dimension_semantics<parallel>], iteration_bounds = array<i64: 1>, scalar_prefetch = 0 : i64, scratch_operands = 0 : i64, tpu.core_type = #tpu.core_type<tc>, window_params = [{transform_indices = @transform_0, window_bounds = array<i64: 8, 128>}, {pipeline_mode = #tpu.pipeline_mode<synchronous>, transform_indices = @transform_1, window_bounds = array<i64: 128, 128>}, {pipeline_mode = #tpu.pipeline_mode<synchronous>, transform_indices = @transform_2, window_bounds = array<i64: 1, 128>}, {pipeline_mode = #tpu.pipeline_mode<synchronous>, transform_indices = @transform_3, window_bounds = array<i64: 128, 128>}, {pipeline_mode = #tpu.pipeline_mode<synchronous>, transform_indices = @transform_4, window_bounds = array<i64: 1, 128>}, {transform_indices = @transform_5, window_bounds = array<i64: 8, 128>}, {transform_indices = @transform_6, window_bounds = array<i64: 8, 1>}]} {
    %c0 = arith.constant 0 : index
    %c0_0 = arith.constant 0 : index
    %0 = vector.load %arg1[%c0, %c0_0] : memref<8x128xf32, #tpu.memory_space<vmem>>, vector<8x128xf32>
    %c0_1 = arith.constant 0 : index
    %c0_2 = arith.constant 0 : index
    %1 = vector.load %arg2[%c0_1, %c0_2] : memref<128x128xf32, #tpu.memory_space<vmem>>, vector<128x128xf32>
    %cst = arith.constant dense<0.000000e+00> : vector<8x128xf32>
    %2 = tpu.matmul %0, %1, %cst {dimension_numbers = #tpu.dot_dimension_numbers<[1], [0], [0], [1], [0, 0, 1, 1], [], []>} : vector<8x128xf32>, vector<128x128xf32>, vector<8x128xf32> -> vector<8x128xf32>
    %c0_3 = arith.constant 0 : index
    %c0_4 = arith.constant 0 : index
    %3 = vector.load %arg3[%c0_3, %c0_4] : memref<1x128xf32, #tpu.memory_space<vmem>>, vector<1x128xf32>
    %4 = vector.broadcast %3 : vector<1x128xf32> to vector<8x128xf32>
    %5 = arith.addf %2, %4 : vector<8x128xf32>
    %6 = math.tanh %5 : vector<8x128xf32>
    %c0_5 = arith.constant 0 : index
    %c0_6 = arith.constant 0 : index
    %7 = vector.load %arg4[%c0_5, %c0_6] : memref<128x128xf32, #tpu.memory_space<vmem>>, vector<128x128xf32>
    %cst_7 = arith.constant dense<0.000000e+00> : vector<8x128xf32>
    %8 = tpu.matmul %6, %7, %cst_7 {dimension_numbers = #tpu.dot_dimension_numbers<[1], [0], [0], [1], [0, 0, 1, 1], [], []>} : vector<8x128xf32>, vector<128x128xf32>, vector<8x128xf32> -> vector<8x128xf32>
    %c0_8 = arith.constant 0 : index
    %c0_9 = arith.constant 0 : index
    %9 = vector.load %arg5[%c0_8, %c0_9] : memref<1x128xf32, #tpu.memory_space<vmem>>, vector<1x128xf32>
    %10 = vector.broadcast %9 : vector<1x128xf32> to vector<8x128xf32>
    %11 = arith.addf %8, %10 : vector<8x128xf32>
    %cst_10 = arith.constant dense<0xFF800000> : vector<8xf32>
    %12 = vector.multi_reduction <maximumf>, %11, %cst_10 [1] : vector<8x128xf32> to vector<8xf32>
    %13 = vector.shape_cast %12 : vector<8xf32> to vector<8x1xf32>
    %14 = vector.broadcast %13 : vector<8x1xf32> to vector<8x128xf32>
    %15 = arith.subf %11, %14 : vector<8x128xf32>
    %16 = math.exp %15 : vector<8x128xf32>
    %cst_11 = arith.constant dense<0.000000e+00> : vector<8xf32>
    %17 = vector.multi_reduction <add>, %16, %cst_11 [1] : vector<8x128xf32> to vector<8xf32>
    %18 = vector.shape_cast %17 : vector<8xf32> to vector<8x1xf32>
    %19 = tpu.reciprocal %18 : vector<8x1xf32> -> vector<8x1xf32>
    %20 = vector.broadcast %19 : vector<8x1xf32> to vector<8x128xf32>
    %21 = arith.mulf %16, %20 : vector<8x128xf32>
    %c0_12 = arith.constant 0 : index
    %c0_13 = arith.constant 0 : index
    %22 = vector.load %arg6[%c0_12, %c0_13] : memref<8x128xf32, #tpu.memory_space<vmem>>, vector<8x128xf32>
    tpu.vector_store %arg6[%c0_12, %c0_13], %21 {strides = array<i32>} : memref<8x128xf32, #tpu.memory_space<vmem>>, vector<8x128xf32>,
    %23 = tpu.iota {dimensions = array<i32: 1>} : vector<8x128xi32>
    %24 = vector.broadcast %13 : vector<8x1xf32> to vector<8x128xf32>
    %25 = arith.cmpf oeq, %11, %24 : vector<8x128xf32>
    %c128_i32 = arith.constant 128 : i32
    %26 = vector.broadcast %c128_i32 : i32 to vector<8x128xi32>
    %27 = arith.select %25, %23, %26 : vector<8x128xi1>, vector<8x128xi32>
    %cst_14 = arith.constant dense<2147483647> : vector<8xi32>
    %28 = vector.multi_reduction <minsi>, %27, %cst_14 [1] : vector<8x128xi32> to vector<8xi32>
    %29 = vector.shape_cast %28 : vector<8xi32> to vector<8x1xi32>
    %c0_15 = arith.constant 0 : index
    %c0_16 = arith.constant 0 : index
    %30 = vector.load %arg7[%c0_15, %c0_16] : memref<8x1xi32, #tpu.memory_space<vmem>>, vector<8x1xi32>
    tpu.vector_store %arg7[%c0_15, %c0_16], %29 {strides = array<i32>} : memref<8x1xi32, #tpu.memory_space<vmem>>, vector<8x1xi32>,
    return
  }
  func.func @transform_0(%arg0: i32) -> (i32, i32) {
    %c0_i32 = arith.constant 0 : i32
    %c0_i32_0 = arith.constant 0 : i32
    return %arg0, %c0_i32 : i32, i32
  }
  func.func @transform_1(%arg0: i32) -> (i32, i32) {
    %c0_i32 = arith.constant 0 : i32
    %c0_i32_0 = arith.constant 0 : i32
    %c0_i32_1 = arith.constant 0 : i32
    return %c0_i32, %c0_i32_0 : i32, i32
  }
  func.func @transform_2(%arg0: i32) -> (i32, i32) {
    %c0_i32 = arith.constant 0 : i32
    %c0_i32_0 = arith.constant 0 : i32
    %c0_i32_1 = arith.constant 0 : i32
    return %c0_i32, %c0_i32_0 : i32, i32
  }
  func.func @transform_3(%arg0: i32) -> (i32, i32) {
    %c0_i32 = arith.constant 0 : i32
    %c0_i32_0 = arith.constant 0 : i32
    %c0_i32_1 = arith.constant 0 : i32
    return %c0_i32, %c0_i32_0 : i32, i32
  }
  func.func @transform_4(%arg0: i32) -> (i32, i32) {
    %c0_i32 = arith.constant 0 : i32
    %c0_i32_0 = arith.constant 0 : i32
    %c0_i32_1 = arith.constant 0 : i32
    return %c0_i32, %c0_i32_0 : i32, i32
  }
  func.func @transform_5(%arg0: i32) -> (i32, i32) {
    %c0_i32 = arith.constant 0 : i32
    %c0_i32_0 = arith.constant 0 : i32
    return %arg0, %c0_i32 : i32, i32
  }
  func.func @transform_6(%arg0: i32) -> (i32, i32) {
    %c0_i32 = arith.constant 0 : i32
    %c0_i32_0 = arith.constant 0 : i32
    return %arg0, %c0_i32 : i32, i32
  }
}

</mosaic_0001>

<bundles_post_ra>
// kernel: tpu_custom_call.1
= control target key start
LH: loop header
LB: loop body
LE: loop exit
PB: predicated region body
PF: predicated region fallthrough
CT: control target
= control target key end

     0   :  { %12 = vsyncpa [#allocation3], 0  ;;  %s604_s0 = inlined_call_operand.hbm [shape: f32[8,1024], index: 0, kind: input, shape index: {}]   ;;  %s605_s1 = inlined_call_operand.hbm [shape: f32[128,128], index: 1, kind: input, shape index: {}]   ;;  %s606_s2 = inlined_call_operand.vmem [shape: f32[1,128], index: 2, kind: input, shape index: {}]   ;;  %s607_s3 = inlined_call_operand.hbm [shape: f32[128,128], index: 3, kind: input, shape index: {}]   ;;  %s608_s4 = inlined_call_operand.vmem [shape: f32[1,128], index: 4, kind: input, shape index: {}]   ;;  %s609_s5 = inlined_call_operand.hbm [shape: f32[8,128], index: 5, kind: output, shape index: {0}]   ;;  %s610_s6 = inlined_call_operand.vmem [shape: s32[8,1], index: 6, kind: output, shape index: {1}]  }
   0x1   :  { %13 = vsyncpa [#allocation6], 0 }
   0x2   :  { %14 = vsyncpa [#allocation4], 0  ;;  %s506_s21 = smov [#allocation5]  }
   0x3   :  { %s30_s22 = sshll.u32 %s506_s21, 4  ;;  %s31_s22 = int_to_ptr.vmem [resolvable:$true] %s30_s22 }
   0x4   :  { %s428_s23 = scalar_lea.vmem %s31_s22, 2048  ;;  %p433_p1 = scmp.lt.s32.totalorder %s31_s22, %s31_s22 }
   0x5   :  { %p429_p0 = scmp.ne.s32.totalorder %s31_s22, %s428_s23  ;;  %p434_p2 = scmp.lt.s32.totalorder %s428_s23, %s428_s23 }
   0x7   :  { %p435_p3 = por %p434_p2, %p433_p1 }
   0x9   :  { %p436_p4 = pnand %p435_p3, %p429_p0 }
   0xb   :  { %439 = shalt.err (!%p436_p4)
}
   0xc   :  { %s507_s24 = smov 128   ;;  %s508_s25 = smov 8  }
   0xd   :  { %36 = dma.hbm_to_vmem [thread:$0]  %s605_s1, 2048, %s31_s22, [#allocation6], %s507_s24, %s507_s24, %s508_s25  }
   0xe   :  { %s509_s28 = smov [#allocation2]   ;;  %s510_s30 = smov [#allocation7]  }
   0xf   :  { %s21_s29 = sshll.u32 %s509_s28, 4  ;;  %s44_s7 = sshll.u32 %s510_s30, 4  ;;  %s22_s29 = int_to_ptr.vmem [resolvable:$true] %s21_s29  ;;  %s45_s7 = int_to_ptr.vmem [resolvable:$true] %s44_s7 }
  0x10   :  { %s448_s8 = scalar_lea.vmem %s22_s29, 128  ;;  %p453_p6 = scmp.lt.s32.totalorder %s22_s29, %s22_s29 }
  0x11   :  { %p449_p5 = scmp.ne.s32.totalorder %s22_s29, %s448_s8  ;;  %p454_p7 = scmp.lt.s32.totalorder %s448_s8, %s448_s8 }
  0x13   :  { %p455_p8 = por %p454_p7, %p453_p6 }
  0x15   :  { %p456_p9 = pnand %p455_p8, %p449_p5 }
  0x17   :  { %459 = shalt.err (!%p456_p9)
}
  0x18   :  { %24 = dma.hbm_to_vmem [thread:$0]  %s604_s0, 128, %s22_s29, [#allocation3]  }
  0x19   :  { %s468_s11 = scalar_lea.vmem %s45_s7, 2048  ;;  %p473_p11 = scmp.lt.s32.totalorder %s45_s7, %s45_s7 }
  0x1a   :  { %p469_p10 = scmp.ne.s32.totalorder %s45_s7, %s468_s11  ;;  %p474_p12 = scmp.lt.s32.totalorder %s468_s11, %s468_s11 }
  0x1c   :  { %p475_p13 = por %p474_p12, %p473_p11 }
  0x1e   :  { %p476_p0 = pnand %p475_p13, %p469_p10 }
  0x20   :  { %479 = shalt.err (!%p476_p0)
}
  0x21   :  { %50 = dma.hbm_to_vmem [thread:$0]  %s607_s3, 2048, %s45_s7, [#allocation6], %s507_s24, %s507_s24, %s508_s25  }
  0x22   :  { %500 = dma.done.wait [#allocation3], 128  }
  0x23   :  { %501 = vsyncadd [#allocation3], 4294967168 }
  0x24   :  { %502 = dma.done.wait [#allocation6], 4096  }
  0x25   :  { %503 = vsyncadd [#allocation6], 4294963200  ;;  %v511_v0 = vmov 0.0   ;;  %vm512_vm0 = vmmov 0   ;;  %v78_v1 = vld [vmem:[#allocation5 + $0x78] sm:$0xff]  ;;  %v77_v2 = vld [vmem:[#allocation5 + $0x70] sm:$0xff]  ;;  %v260_v43 = vlaneseq }
  0x26   :  { %336 = vmatprep.subr.mxu0 %v511_v0  ;;  %368 = vmatprep.mubr.msk.f32.mxu0 %vm512_vm0, %v511_v0  ;;  %v76_v3 = vld [vmem:[#allocation5 + $0x68] sm:$0xff]  ;;  %v75_v4 = vld [vmem:[#allocation5 + $0x60] sm:$0xff]  ;;  %v172_v5 = vld [vmem:[#allocation7 + $0x78] sm:$0xff] }
  0x27   :  { %371 = vmatprep.subr.mxu1 %v511_v0  ;;  %403 = vmatprep.mubr.msk.f32.mxu1 %vm512_vm0, %v511_v0  ;;  %v74_v6 = vld [vmem:[#allocation5 + $0x58] sm:$0xff]  ;;  %v171_v7 = vld [vmem:[#allocation7 + $0x70] sm:$0xff]  ;;  %v170_v8 = vld [vmem:[#allocation7 + $0x68] sm:$0xff]  ;;  %v261_v44 = vand.u32 127, %v260_v43 }
  0x28   :  { %337 = vmatpush3.msra.mxu0 %v78_v1  ;;  %372 = vmatpush3.msra.mxu1 %v172_v5  ;;  %v73_v9 = vld [vmem:[#allocation5 + $0x50] sm:$0xff]  ;;  %v169_v10 = vld [vmem:[#allocation7 + $0x60] sm:$0xff]  ;;  %v72_v11 = vld [vmem:[#allocation5 + $0x48] sm:$0xff] }
  0x29   :  { %338 = vmatprep.subr.mxu0 %v511_v0  ;;  %373 = vmatprep.subr.mxu1 %v511_v0  ;;  %v168_v12 = vld [vmem:[#allocation7 + $0x58] sm:$0xff]  ;;  %v71_v13 = vld [vmem:[#allocation5 + $0x40] sm:$0xff]  ;;  %v167_v14 = vld [vmem:[#allocation7 + $0x50] sm:$0xff] }
  0x2a   :  { %339 = vmatpush3.msra.mxu0 %v77_v2  ;;  %374 = vmatpush3.msra.mxu1 %v171_v7  ;;  %v70_v15 = vld [vmem:[#allocation5 + $0x38] sm:$0xff]  ;;  %v166_v16 = vld [vmem:[#allocation7 + $0x48] sm:$0xff]  ;;  %v69_v17 = vld [vmem:[#allocation5 + $0x30] sm:$0xff] }
  0x2b   :  { %340 = vmatprep.subr.mxu0 %v511_v0  ;;  %375 = vmatprep.subr.mxu1 %v511_v0  ;;  %v68_v18 = vld [vmem:[#allocation5 + $0x28] sm:$0xff]  ;;  %v67_v19 = vld [vmem:[#allocation5 + $0x20] sm:$0xff]  ;;  %v66_v20 = vld [vmem:[#allocation5 + $0x18] sm:$0xff] }
  0x2c   :  { %341 = vmatpush3.msra.mxu0 %v76_v3  ;;  %376 = vmatpush3.msra.mxu1 %v170_v8  ;;  %v65_v21 = vld [vmem:[#allocation5 + $0x10] sm:$0xff]  ;;  %v64_v22 = vld [vmem:[#allocation5 + $0x8] sm:$0xff]  ;;  %v63_v23 = vld [vmem:[#allocation5] sm:$0xff] }
  0x2d   :  { %342 = vmatprep.subr.mxu0 %v511_v0  ;;  %377 = vmatprep.subr.mxu1 %v511_v0  ;;  %v62_v24 = vld [vmem:[#allocation2] sm:$0xff]  ;;  %v165_v25 = vld [vmem:[#allocation7 + $0x40] sm:$0xff]  ;;  %v163_v27 = vld [vmem:[#allocation7 + $0x30] sm:$0xff] }
  0x2e   :  { %343 = vmatpush3.msra.mxu0 %v75_v4  ;;  %378 = vmatpush3.msra.mxu1 %v169_v10  ;;  %v164_v26 = vld [vmem:[#allocation7 + $0x38] sm:$0xff]  ;;  %v162_v28 = vld [vmem:[#allocation7 + $0x28] sm:$0xff]  ;;  %v161_v29 = vld [vmem:[#allocation7 + $0x20] sm:$0xff] }
  0x2f   :  { %344 = vmatprep.subr.mxu0 %v511_v0  ;;  %379 = vmatprep.subr.mxu1 %v511_v0  ;;  %v160_v30 = vld [vmem:[#allocation7 + $0x18] sm:$0xff]  ;;  %v159_v31 = vld [vmem:[#allocation7 + $0x10] sm:$0xff]  ;;  %v158_v32 = vld [vmem:[#allocation7 + $0x8] sm:$0xff] }
  0x30   :  { %345 = vmatpush3.msra.mxu0 %v74_v6  ;;  %380 = vmatpush3.msra.mxu1 %v168_v12  ;;  %v157_v33 = vld [vmem:[#allocation7] sm:$0xff]  ;;  %v300_v34 = vld [vmem:[%s606_s2] ss:$0 sm:$0xff]  ;;  %s513_s2 = smov [#allocation8]  }
  0x31   :  { %346 = vmatprep.subr.mxu0 %v511_v0  ;;  %381 = vmatprep.subr.mxu1 %v511_v0  ;;  %v301_v39 = vld [vmem:[%s608_s4] ss:$0 sm:$0xff]  ;;  %s286_s4 = sshll.u32 %s513_s2, 4  ;;  %s287_s4 = int_to_ptr.vmem [resolvable:$true] %s286_s4 }
  0x32   :  { %347 = vmatpush3.msra.mxu0 %v73_v9  ;;  %382 = vmatpush3.msra.mxu1 %v167_v14  ;;  %s480_s15 = scalar_lea.vmem %s287_s4, 128  ;;  %p485_p2 = scmp.lt.s32.totalorder %s287_s4, %s287_s4 }
  0x33   :  { %348 = vmatprep.subr.mxu0 %v511_v0  ;;  %383 = vmatprep.subr.mxu1 %v511_v0  ;;  %p481_p1 = scmp.ne.s32.totalorder %s287_s4, %s480_s15  ;;  %p486_p3 = scmp.lt.s32.totalorder %s480_s15, %s480_s15 }
  0x34   :  { %349 = vmatpush3.msra.mxu0 %v72_v11  ;;  %384 = vmatpush3.msra.mxu1 %v166_v16 }
  0x35   :  { %350 = vmatprep.subr.mxu0 %v511_v0  ;;  %385 = vmatprep.subr.mxu1 %v511_v0  ;;  %p487_p4 = por %p486_p3, %p485_p2 }
  0x36   :  { %351 = vmatpush3.msra.mxu0 %v71_v13  ;;  %386 = vmatpush3.msra.mxu1 %v165_v25 }
  0x37   :  { %352 = vmatprep.subr.mxu0 %v511_v0  ;;  %387 = vmatprep.subr.mxu1 %v511_v0  ;;  %p488_p5 = pnand %p487_p4, %p481_p1 }
  0x38   :  { %353 = vmatpush3.msra.mxu0 %v70_v15  ;;  %388 = vmatpush3.msra.mxu1 %v164_v26 }
  0x39   :  { %354 = vmatprep.subr.mxu0 %v511_v0  ;;  %389 = vmatprep.subr.mxu1 %v511_v0 }
  0x3a   :  { %355 = vmatpush3.msra.mxu0 %v69_v17  ;;  %390 = vmatpush3.msra.mxu1 %v163_v27 }
  0x3b   :  { %356 = vmatprep.subr.mxu0 %v511_v0  ;;  %391 = vmatprep.subr.mxu1 %v511_v0 }
  0x3c   :  { %357 = vmatpush3.msra.mxu0 %v68_v18  ;;  %392 = vmatpush3.msra.mxu1 %v162_v28 }
  0x3d   :  { %358 = vmatprep.subr.mxu0 %v511_v0  ;;  %393 = vmatprep.subr.mxu1 %v511_v0 }
  0x3e   :  { %359 = vmatpush3.msra.mxu0 %v67_v19  ;;  %394 = vmatpush3.msra.mxu1 %v161_v29 }
  0x3f   :  { %360 = vmatprep.subr.mxu0 %v511_v0  ;;  %395 = vmatprep.subr.mxu1 %v511_v0 }
  0x40   :  { %361 = vmatpush3.msra.mxu0 %v66_v20  ;;  %396 = vmatpush3.msra.mxu1 %v160_v30 }
  0x41   :  { %362 = vmatprep.subr.mxu0 %v511_v0  ;;  %397 = vmatprep.subr.mxu1 %v511_v0 }
  0x42   :  { %363 = vmatpush3.msra.mxu0 %v65_v21  ;;  %398 = vmatpush3.msra.mxu1 %v159_v31 }
  0x43   :  { %364 = vmatprep.subr.mxu0 %v511_v0  ;;  %399 = vmatprep.subr.mxu1 %v511_v0 }
  0x44   :  { %365 = vmatpush3.msra.mxu0 %v64_v22  ;;  %400 = vmatpush3.msra.mxu1 %v158_v32 }
  0x45   :  { %366 = vmatprep.subr.mxu0 %v511_v0  ;;  %401 = vmatprep.subr.mxu1 %v511_v0 }
  0x46   :  { %367 = vmatpush3.msra.mxu0 %v63_v23  ;;  %402 = vmatpush3.msra.mxu1 %v157_v33 }
  0x47   :  { %369 = vmatmul.mubr.f32.vlgmr.msra.gmra.mxu0 %v62_v24 }
 0x107   :  { %v152_v35 = vpop.f32.mrf.mxu0 }
 0x108   :  { %v153_v36 = vadd.f32 %v300_v34, %v152_v35 }
 0x109   :  { %v370_v37 = vpop.f32.mrf.mxu0 }
 0x10a   :  { %414 = vtanh.f32 %v153_v36 }
 0x117   :  { %v415_v38 = vpop.eup %414 }
 0x118   :  { %404 = vmatmul.mubr.f32.vlgmr.msra.gmra.mxu1 %v415_v38 }
 0x1d8   :  { %v246_v40 = vpop.f32.mrf.mxu1 }
 0x1d9   :  { %v247_v41 = vadd.f32 %v301_v39, %v246_v40 }
 0x1da   :  { %v405_v42 = vpop.f32.mrf.mxu1 }
 0x1db   :  { %250 = vmax.xlane.f32.xlu0 %v247_v41 }
 0x264   :  { %v251_v45 = vpop.xlane.xlu0 %250 }
 0x265   :  { %v252_v46 = vsub.f32 %v247_v41, %v251_v45  ;;  %vm262_vm1 = vcmp.eq.f32.partialorder %v247_v41, %v251_v45 }
 0x266   :  { %v263_v47 = vsel %vm262_vm1, %v261_v44, 128 }
 0x267   :  { %v253_v48 = vmul.f32 1.442695, %v252_v46  ;;  %v265_v49 = vshra.s32 %v263_v47, 16  ;;  %v264_v52 = vand.u32 65535, %v263_v47 }
 0x269   :  { %416 = vpow2.f32 %v253_v48  ;;  %v267_v50 = vcvt.s32.f32 %v265_v49  ;;  %v266_v54 = vcvt.s32.f32 %v264_v52 }
 0x26b   :  { %268 = vmin.xlane.f32.xlu0 %v267_v50 }
 0x276   :  { %v417_v51 = vpop.eup %416 }
 0x277   :  { %255 = vadd.xlane.f32.xlu1 %v417_v51 }
 0x2f4   :  { %v269_v53 = vpop.xlane.xlu0 %268 }
 0x2f5   :  { %vm270_vm2 = vcmp.eq.f32.partialorder %v267_v50, %v269_v53 }
 0x2f6   :  { %v271_v55 = vsel %vm270_vm2, %v266_v54, inf }
 0x2f7   :  { %272 = vmin.xlane.f32.xlu1 %v271_v55 }
 0x300   :  { %v256_v56 = vpop.xlane.xlu1 %255 }
 0x301   :  { %418 = vrcp.f32 %v256_v56 }
 0x30e   :  { %v419_v57 = vpop.eup %418 }
 0x30f   :  { %v258_v58 = vmul.f32 %v419_v57, %v417_v51 }
 0x311   :  { %259 = vst [vmem:[#allocation8] sm:$0xff] %v258_v58 }
 0x312   :  { %491 = shalt.err (!%p488_p5)
}
 0x313   :  { %289 = dma.vmem_to_hbm [thread:$0]  %s287_s4, 128, %s609_s5, [#allocation4]   ;;  %v275_v59 = vcvt.f32.s32 %v269_v53  ;;  %vm278_vm3 = vcmask 7168  }
 0x315   :  { %v276_v61 = vshll.u32 %v275_v59, 16 }
 0x380   :  { %v273_v60 = vpop.xlane.xlu1 %272 }
 0x381   :  { %v274_v62 = vcvt.f32.s32 %v273_v60 }
 0x383   :  { %v277_v63 = vadd.s32 %v276_v61, %v274_v62 }
 0x385   :  { %279 = vst.msk [vmem:[%s610_s6] sm:$0xff] %vm278_vm3, %v277_v63 }
 0x386   :  { %504 = dma.done.wait [#allocation4], 128  }
 0x387   :  { %505 = vsyncadd [#allocation4], 4294967168 }
 0x388   :  { %297 = vsyncpa [#allocation3], 1 }
 0x389   :  { %298 = vsyncpa [#allocation6], 1 }
 0x38a   :  { %299 = vsyncpa [#allocation4], 1 }

</bundles_post_ra>
